<compile_context>
chip_gen: v6e
topology: v6e:2x2x1
jax: 0.10.0
libtpu: 0.0.40
codegen_flags: <defaults>
</compile_context>

<pallas_src>
import jax
import jax.numpy as jnp
from jax.experimental import pallas as pl
from jax.experimental.pallas import tpu as pltpu


def _round_up(x: int, m: int) -> int:
    return (x + m - 1) // m * m


def _default_act_dtype():
    """bf16 tanh/bias on chips with a bf16 VPU/EUP (v6e, v7x); f32 elsewhere."""
    try:
        kind = jax.devices()[0].device_kind.lower()
    except Exception:
        return jnp.float32
    return jnp.bfloat16 if ("v6" in kind or "v7" in kind) else jnp.float32


def _make_critic_kernel(act_dtype):
    def kernel(obs_ref, w1t_ref, b1_ref, w2t_ref, b2_ref, w3_ref, b3_ref,
               out_ref):
        # obs tile: [TB, D] f32 (batch on sublanes).  Transpose once so batch
        # lives on lanes for the rest of the network (dense vregs, lane-dense
        # output).  Transpose in f32 (robust XLU path), cast to bf16 for MXU.
        x_t = obs_ref[...].T.astype(jnp.bfloat16)               # [D, TB]

        z1 = jnp.dot(w1t_ref[...], x_t,
                     preferred_element_type=jnp.float32)        # [H, TB] f32
        h1 = jnp.tanh((z1 + b1_ref[...]).astype(act_dtype))     # [H, TB]

        z2 = jnp.dot(w2t_ref[...], h1.astype(jnp.bfloat16),
                     preferred_element_type=jnp.float32)        # [H, TB] f32
        h2 = jnp.tanh((z2 + b2_ref[...]).astype(act_dtype))     # [H, TB]

        # Final 64 -> 1 projection: VPU multiply + sublane reduce; the result
        # is already lane-dense.  (No wasteful N=1 MXU pass.)
        v = jnp.sum(h2.astype(jnp.float32) * w3_ref[...],
                    axis=0, keepdims=True)                      # [1, TB] f32
        out_ref[...] = v + b3_ref[...]                          # b3 broadcasts over lanes

    return kernel


def critic_forward(obs, w1, b1, w2, b2, w3, b3, *,
                   tile_b: int = 4096, act_dtype=None):
    """Fused Critic forward.

    obs: [B, D] float32.
    w1: [D, H], w2: [H, H], w3: [H, 1]   (weights stored as [in, out]).
    b1, b2: [1, H] (or [H]), b3: [1, 1] (or [1]).
    Returns [B, 1] float32.
    """
    obs = jnp.asarray(obs, jnp.float32)
    B, D = obs.shape
    H = w1.shape[1]

    if act_dtype is None:
        act_dtype = _default_act_dtype()

    # Parameter prep (tiny, one-time): transposed bf16 weights for the MXU,
    # column-shaped f32 biases / final weight for the lane-major activations.
    w1t = jnp.asarray(w1, jnp.float32).T.astype(jnp.bfloat16)    # [H, D]
    w2t = jnp.asarray(w2, jnp.float32).T.astype(jnp.bfloat16)    # [H, H]
    b1c = jnp.asarray(b1, jnp.float32).reshape(H, 1)
    b2c = jnp.asarray(b2, jnp.float32).reshape(H, 1)
    w3c = jnp.asarray(w3, jnp.float32).reshape(H, 1)
    b3c = jnp.asarray(b3, jnp.float32).reshape(1, 1)

    # Batch tile: large enough to amortize the fixed per-grid-step cost, but
    # capped at ~ceil(B/2) so big batches always produce >= 2 grid steps
    # (v7x: 2 TensorCores split the parallel axis; no-op on v5e/v6e).
    # Always a multiple of 128 so blocks stay (8,128)-aligned and lane-dense.
    TB = min(tile_b, _round_up(B, 128))
    if B > 256:
        TB = min(TB, _round_up(pl.cdiv(B, 2), 128))
    num_tiles = pl.cdiv(B, TB)

    cost = pl.CostEstimate(
        flops=2 * B * (D * H + H * H + H),
        transcendentals=2 * H * B,
        bytes_accessed=B * (D * 4 + 4) + 2 * (D * H + H * H) + 4 * (3 * H + 1),
    )

    out = pl.pallas_call(
        _make_critic_kernel(act_dtype),
        out_shape=jax.ShapeDtypeStruct((num_tiles, 1, TB), jnp.float32),
        grid=(num_tiles,),
        in_specs=[
            # Streamed per grid step (double-buffered DMA). Last block may be
            # partial; garbage rows only reach their own (discarded) outputs.
            pl.BlockSpec((TB, D), lambda i: (i, 0)),
            # VMEM-resident across all grid steps (constant block index).
            pl.BlockSpec((H, D), lambda i: (0, 0)),
            pl.BlockSpec((H, 1), lambda i: (0, 0)),
            pl.BlockSpec((H, H), lambda i: (0, 0)),
            pl.BlockSpec((H, 1), lambda i: (0, 0)),
            pl.BlockSpec((H, 1), lambda i: (0, 0)),
            pl.BlockSpec((1, 1), lambda i: (0, 0)),
        ],
        # Lane-dense output row per tile; kernel sees a (1, TB) ref.
        out_specs=pl.BlockSpec((None, 1, TB), lambda i: (i, 0, 0)),
        compiler_params=pltpu.CompilerParams(
            dimension_semantics=("parallel",)),
        cost_estimate=cost,
    )(obs, w1t, b1c, w2t, b2c, w3c, b3c)

    # (num_tiles, 1, TB) -> (num_tiles*TB, 1) is a free row-major reshape;
    # the trailing (num_tiles*TB - B) rows are the partial-block tail.
    return out.reshape(num_tiles * TB, 1)[:B]


def reference_forward(obs, w1, b1, w2, b2, w3, b3):
    h1 = jnp.tanh(obs @ w1 + b1.reshape(1, -1))
    h2 = jnp.tanh(h1 @ w2 + b2.reshape(1, -1))
    return h2 @ w3 + b3.reshape(1, -1)


if __name__ == "__main__":
    key = jax.random.PRNGKey(0)
    D, H, O = 16, 64, 1          # obs_space.shape=(16,) -> n_input=16

    ks = jax.random.split(key, 7)
    # Deterministic synthetic params ([in, out] weights, [1, out] biases).
    w1 = jax.random.normal(ks[1], (D, H), dtype=jnp.float32) * 0.1
    b1 = jax.random.normal(ks[2], (1, H), dtype=jnp.float32) * 0.1
    w2 = jax.random.normal(ks[3], (H, H), dtype=jnp.float32) * 0.1
    b2 = jax.random.normal(ks[4], (1, H), dtype=jnp.float32) * 0.1
    w3 = jax.random.normal(ks[5], (H, O), dtype=jnp.float32) * 0.1
    b3 = jax.random.normal(ks[6], (1, O), dtype=jnp.float32) * 0.1

    # Small batch (B=2, single partial tile), ragged multi-tile (B=1037 -> 2
    # tiles via the >=2-step cap), and a >2-tile case (B=9001).
    for B in (2, 1037, 9001):
        obs = jax.random.normal(ks[0], (B, D), dtype=jnp.float32)

        out = critic_forward(obs, w1, b1, w2, b2, w3, b3)
        jax.block_until_ready(out)

        ref = reference_forward(obs, w1, b1, w2, b2, w3, b3)
        assert out.shape == (B, O), (out.shape, (B, O))
        # bf16 MXU operands (f32 accumulation) -> small drift vs f32 reference.
        assert jnp.allclose(out, ref, atol=2e-2, rtol=2e-2), (
            B, float(jnp.max(jnp.abs(out - ref))))

    print("KERNEL_OK")
</pallas_src>

<mosaic_0001>
module attributes {stable_mosaic.version = 11 : i64} {
  func.func @kernel(%arg0: i32, %arg1: memref<128x16xf32, #tpu.memory_space<vmem>>, %arg2: memref<64x16xbf16, #tpu.memory_space<vmem>>, %arg3: memref<64x1xf32, #tpu.memory_space<vmem>>, %arg4: memref<64x64xbf16, #tpu.memory_space<vmem>>, %arg5: memref<64x1xf32, #tpu.memory_space<vmem>>, %arg6: memref<64x1xf32, #tpu.memory_space<vmem>>, %arg7: memref<1x1xf32, #tpu.memory_space<vmem>>, %arg8: memref<1x1x128xf32, #tpu.memory_space<vmem>>) attributes {dimension_semantics = [#tpu.dimension_semantics<parallel>], iteration_bounds = array<i64: 1>, scalar_prefetch = 0 : i64, scratch_operands = 0 : i64, tpu.core_type = #tpu.core_type<tc>, window_params = [{transform_indices = @transform_0, window_bounds = array<i64: 128, 16>}, {pipeline_mode = #tpu.pipeline_mode<synchronous>, transform_indices = @transform_1, window_bounds = array<i64: 64, 16>}, {pipeline_mode = #tpu.pipeline_mode<synchronous>, transform_indices = @transform_2, window_bounds = array<i64: 64, 1>}, {pipeline_mode = #tpu.pipeline_mode<synchronous>, transform_indices = @transform_3, window_bounds = array<i64: 64, 64>}, {pipeline_mode = #tpu.pipeline_mode<synchronous>, transform_indices = @transform_4, window_bounds = array<i64: 64, 1>}, {pipeline_mode = #tpu.pipeline_mode<synchronous>, transform_indices = @transform_5, window_bounds = array<i64: 64, 1>}, {pipeline_mode = #tpu.pipeline_mode<synchronous>, transform_indices = @transform_6, window_bounds = array<i64: 1, 1>}, {transform_indices = @transform_7, window_bounds = array<i64: 1, 1, 128>}]} {
    %c0 = arith.constant 0 : index
    %c0_0 = arith.constant 0 : index
    %0 = vector.load %arg1[%c0, %c0_0] : memref<128x16xf32, #tpu.memory_space<vmem>>, vector<128x16xf32>
    %1 = tpu.transpose %0, [1, 0] : vector<128x16xf32> -> vector<16x128xf32>
    %2 = arith.truncf %1 : vector<16x128xf32> to vector<16x128xbf16>
    %c0_1 = arith.constant 0 : index
    %c0_2 = arith.constant 0 : index
    %3 = vector.load %arg2[%c0_1, %c0_2] : memref<64x16xbf16, #tpu.memory_space<vmem>>, vector<64x16xbf16>
    %cst = arith.constant dense<0.000000e+00> : vector<64x128xf32>
    %4 = tpu.matmul %3, %2, %cst {dimension_numbers = #tpu.dot_dimension_numbers<[1], [0], [0], [1], [0, 0, 1, 1], [], []>} : vector<64x16xbf16>, vector<16x128xbf16>, vector<64x128xf32> -> vector<64x128xf32>
    %c0_3 = arith.constant 0 : index
    %c0_4 = arith.constant 0 : index
    %5 = vector.load %arg3[%c0_3, %c0_4] : memref<64x1xf32, #tpu.memory_space<vmem>>, vector<64x1xf32>
    %6 = vector.broadcast %5 : vector<64x1xf32> to vector<64x128xf32>
    %7 = arith.addf %4, %6 : vector<64x128xf32>
    %8 = math.tanh %7 : vector<64x128xf32>
    %c0_5 = arith.constant 0 : index
    %c0_6 = arith.constant 0 : index
    %9 = vector.load %arg4[%c0_5, %c0_6] : memref<64x64xbf16, #tpu.memory_space<vmem>>, vector<64x64xbf16>
    %10 = arith.truncf %8 : vector<64x128xf32> to vector<64x128xbf16>
    %cst_7 = arith.constant dense<0.000000e+00> : vector<64x128xf32>
    %11 = tpu.matmul %9, %10, %cst_7 {dimension_numbers = #tpu.dot_dimension_numbers<[1], [0], [0], [1], [0, 0, 1, 1], [], []>} : vector<64x64xbf16>, vector<64x128xbf16>, vector<64x128xf32> -> vector<64x128xf32>
    %c0_8 = arith.constant 0 : index
    %c0_9 = arith.constant 0 : index
    %12 = vector.load %arg5[%c0_8, %c0_9] : memref<64x1xf32, #tpu.memory_space<vmem>>, vector<64x1xf32>
    %13 = vector.broadcast %12 : vector<64x1xf32> to vector<64x128xf32>
    %14 = arith.addf %11, %13 : vector<64x128xf32>
    %15 = math.tanh %14 : vector<64x128xf32>
    %c0_10 = arith.constant 0 : index
    %c0_11 = arith.constant 0 : index
    %16 = vector.load %arg6[%c0_10, %c0_11] : memref<64x1xf32, #tpu.memory_space<vmem>>, vector<64x1xf32>
    %17 = vector.broadcast %16 : vector<64x1xf32> to vector<64x128xf32>
    %18 = arith.mulf %15, %17 : vector<64x128xf32>
    %cst_12 = arith.constant dense<0.000000e+00> : vector<128xf32>
    %19 = vector.multi_reduction <add>, %18, %cst_12 [0] : vector<64x128xf32> to vector<128xf32>
    %20 = vector.shape_cast %19 : vector<128xf32> to vector<1x128xf32>
    %c0_13 = arith.constant 0 : index
    %c0_14 = arith.constant 0 : index
    %21 = vector.load %arg7[%c0_13, %c0_14] : memref<1x1xf32, #tpu.memory_space<vmem>>, vector<1x1xf32>
    %22 = vector.broadcast %21 : vector<1x1xf32> to vector<1x128xf32>
    %23 = arith.addf %20, %22 : vector<1x128xf32>
    %c0_15 = arith.constant 0 : index
    %c0_16 = arith.constant 0 : index
    %c0_17 = arith.constant 0 : index
    %24 = vector.load %arg8[%c0_15, %c0_16, %c0_17] : memref<1x1x128xf32, #tpu.memory_space<vmem>>, vector<1x1x128xf32>
    %25 = vector.shape_cast %24 : vector<1x1x128xf32> to vector<1x128xf32>
    %26 = vector.shape_cast %23 : vector<1x128xf32> to vector<1x1x128xf32>
    tpu.vector_store %arg8[%c0_15, %c0_16, %c0_17], %26 {strides = array<i32>} : memref<1x1x128xf32, #tpu.memory_space<vmem>>, vector<1x1x128xf32>,
    return
  }
  func.func @transform_0(%arg0: i32) -> (i32, i32) {
    %c0_i32 = arith.constant 0 : i32
    %c0_i32_0 = arith.constant 0 : i32
    return %arg0, %c0_i32 : i32, i32
  }
  func.func @transform_1(%arg0: i32) -> (i32, i32) {
    %c0_i32 = arith.constant 0 : i32
    %c0_i32_0 = arith.constant 0 : i32
    %c0_i32_1 = arith.constant 0 : i32
    return %c0_i32, %c0_i32_0 : i32, i32
  }
  func.func @transform_2(%arg0: i32) -> (i32, i32) {
    %c0_i32 = arith.constant 0 : i32
    %c0_i32_0 = arith.constant 0 : i32
    %c0_i32_1 = arith.constant 0 : i32
    return %c0_i32, %c0_i32_0 : i32, i32
  }
  func.func @transform_3(%arg0: i32) -> (i32, i32) {
    %c0_i32 = arith.constant 0 : i32
    %c0_i32_0 = arith.constant 0 : i32
    %c0_i32_1 = arith.constant 0 : i32
    return %c0_i32, %c0_i32_0 : i32, i32
  }
  func.func @transform_4(%arg0: i32) -> (i32, i32) {
    %c0_i32 = arith.constant 0 : i32
    %c0_i32_0 = arith.constant 0 : i32
    %c0_i32_1 = arith.constant 0 : i32
    return %c0_i32, %c0_i32_0 : i32, i32
  }
  func.func @transform_5(%arg0: i32) -> (i32, i32) {
    %c0_i32 = arith.constant 0 : i32
    %c0_i32_0 = arith.constant 0 : i32
    %c0_i32_1 = arith.constant 0 : i32
    return %c0_i32, %c0_i32_0 : i32, i32
  }
  func.func @transform_6(%arg0: i32) -> (i32, i32) {
    %c0_i32 = arith.constant 0 : i32
    %c0_i32_0 = arith.constant 0 : i32
    %c0_i32_1 = arith.constant 0 : i32
    return %c0_i32, %c0_i32_0 : i32, i32
  }
  func.func @transform_7(%arg0: i32) -> (i32, i32, i32) {
    %c0_i32 = arith.constant 0 : i32
    %c0_i32_0 = arith.constant 0 : i32
    %c0_i32_1 = arith.constant 0 : i32
    return %arg0, %c0_i32, %c0_i32_0 : i32, i32, i32
  }
}

</mosaic_0001>

<bundles_post_ra>
// kernel: tpu_custom_call.1
= control target key start
LH: loop header
LB: loop body
LE: loop exit
PB: predicated region body
PF: predicated region fallthrough
CT: control target
= control target key end

     0   :  { %s833_s0 = inlined_call_operand.vmem [shape: f32[2,16], index: 0, kind: input, shape index: {}]   ;;  %s834_s1 = inlined_call_operand.vmem [shape: bf16[64,16], index: 1, kind: input, shape index: {}]   ;;  %s835_s2 = inlined_call_operand.vmem [shape: f32[64,1], index: 2, kind: input, shape index: {}]   ;;  %s836_s3 = inlined_call_operand.vmem [shape: bf16[64,64], index: 3, kind: input, shape index: {}]   ;;  %s837_s4 = inlined_call_operand.vmem [shape: f32[64,1], index: 4, kind: input, shape index: {}]   ;;  %s838_s5 = inlined_call_operand.vmem [shape: f32[64,1], index: 5, kind: input, shape index: {}]   ;;  %s839_s6 = inlined_call_operand.<no memory space> [shape: f32[1,1], index: 6, kind: input, shape index: {}]   ;;  %s840_s7 = inlined_call_operand.hbm [shape: f32[1,1,128], index: 7, kind: output, shape index: {}]  }
   0x1   :  { %v12_v0 = vstv %s839_s6 }
   0x2   :  { %13 = vst [vmem:[#allocation2] sm:$0x1] %v12_v0 }
   0x3   :  { %v30_v1 = vld [vmem:[%s833_s0] sm:$0xff]  ;;  %v631_v2 = vmov 0   ;;  %v31_v3 = vld [vmem:[%s833_s0 + $0x8] sm:$0xff]  ;;  %v93_v4 = vld [vmem:[%s835_s2 + $0x30] sm:$0xff]  ;;  %vm155_vm0 = vcmask 130048  }
   0x4   :  { %46 = vxpose.xlu0.b32.start [1/16] (narrow) %v30_v1, 16  ;;  %567 = vset.pattern.permute.xlu1 %v631_v2  ;;  %v32_v5 = vld [vmem:[%s833_s0 + $0x10] sm:$0xff]  ;;  %v94_v6 = vld [vmem:[%s835_s2 + $0x38] sm:$0xff]  ;;  %v569_v7 = vld [vmem:[%s834_s1] sm:$0xff]  }
   0x5   :  { %127 = vperm.xlu1 %567, %v93_v4   ;;  %v33_v8 = vld [vmem:[%s833_s0 + $0x18] sm:$0xff]  ;;  %533 = vmatprep.mubr.msk.bf16.mxu0 %vm155_vm0, %v569_v7  ;;  %v91_v9 = vld [vmem:[%s835_s2 + $0x20] sm:$0xff]  ;;  %v92_v11 = vld [vmem:[%s835_s2 + $0x28] sm:$0xff] }
   0x6   :  { %v34_v10 = vld [vmem:[%s833_s0 + $0x20] sm:$0xff] }
   0x8   :  { %47 = vxpose.xlu0.b32.cont [2/16] (narrow) %v31_v3, 16 }
   0x9   :  { %132 = vperm.xlu1 %567, %v94_v6  }
   0xc   :  { %48 = vxpose.xlu0.b32.cont [3/16] (narrow) %v32_v5, 16 }
   0xd   :  { %117 = vperm.xlu1 %567, %v91_v9  }
  0x10   :  { %49 = vxpose.xlu0.b32.cont [4/16] (narrow) %v33_v8, 16 }
  0x11   :  { %14 = vsyncpa [#allocation4], 0  ;;  %v35_v12 = vld [vmem:[%s833_s0 + $0x28] sm:$0xff]  ;;  %122 = vperm.xlu1 %567, %v92_v11   ;;  %v89_v13 = vld [vmem:[%s835_s2 + $0x10] sm:$0xff]  ;;  %vm321_vm1 = vcmask 523264  }
  0x12   :  { %v36_v14 = vld [vmem:[%s833_s0 + $0x30] sm:$0xff]  ;;  %v90_v15 = vld [vmem:[%s835_s2 + $0x18] sm:$0xff]  ;;  %v87_v17 = vld [vmem:[%s835_s2] sm:$0xff] }
  0x13   :  { %v37_v16 = vld [vmem:[%s833_s0 + $0x38] sm:$0xff]  ;;  %v38_v18 = vld [vmem:[%s833_s0 + $0x40] sm:$0xff]  ;;  %v88_v19 = vld [vmem:[%s835_s2 + $0x8] sm:$0xff] }
  0x14   :  { %50 = vxpose.xlu0.b32.cont [5/16] (narrow) %v34_v10, 16  ;;  %v39_v20 = vld [vmem:[%s833_s0 + $0x48] sm:$0xff]  ;;  %v253_v21 = vld [vmem:[%s837_s4] sm:$0xff]  ;;  %v40_v22 = vld [vmem:[%s833_s0 + $0x50] sm:$0xff] }
  0x15   :  { %107 = vperm.xlu1 %567, %v89_v13   ;;  %v254_v23 = vld [vmem:[%s837_s4 + $0x8] sm:$0xff]  ;;  %v41_v24 = vld [vmem:[%s833_s0 + $0x58] sm:$0xff]  ;;  %v255_v25 = vld [vmem:[%s837_s4 + $0x10] sm:$0xff] }
  0x16   :  { %v42_v26 = vld [vmem:[%s833_s0 + $0x60] sm:$0xff]  ;;  %v256_v27 = vld [vmem:[%s837_s4 + $0x18] sm:$0xff]  ;;  %v43_v28 = vld [vmem:[%s833_s0 + $0x68] sm:$0xff] }
  0x17   :  { %v257_v29 = vld [vmem:[%s837_s4 + $0x20] sm:$0xff]  ;;  %v44_v30 = vld [vmem:[%s833_s0 + $0x70] sm:$0xff]  ;;  %v258_v31 = vld [vmem:[%s837_s4 + $0x28] sm:$0xff] }
  0x18   :  { %51 = vxpose.xlu0.b32.cont [6/16] (narrow) %v35_v12, 16  ;;  %v45_v32 = vld [vmem:[%s833_s0 + $0x78] sm:$0xff]  ;;  %v259_v33 = vld [vmem:[%s837_s4 + $0x30] sm:$0xff]  ;;  %v408_v35 = vld [vmem:[%s838_s5 + $0x8] sm:$0xff] }
  0x19   :  { %112 = vperm.xlu1 %567, %v90_v15   ;;  %v260_v34 = vld [vmem:[%s837_s4 + $0x38] sm:$0xff]  ;;  %v409_v36 = vld [vmem:[%s838_s5 + $0x10] sm:$0xff]  ;;  %v411_v38 = vld [vmem:[%s838_s5 + $0x20] sm:$0xff] }
  0x1a   :  { %v410_v37 = vld [vmem:[%s838_s5 + $0x18] sm:$0xff]  ;;  %v412_v39 = vld [vmem:[%s838_s5 + $0x28] sm:$0xff]  ;;  %v413_v40 = vld [vmem:[%s838_s5 + $0x30] sm:$0xff] }
  0x1b   :  { %v414_v41 = vld [vmem:[%s838_s5 + $0x38] sm:$0xff]  ;;  %v476_v42 = vld [vmem:[#allocation2] sm:$0x1]  ;;  %v570_v46 = vld [vmem:[%s834_s1 + $0x8] sm:$0xff]  }
  0x1c   :  { %52 = vxpose.xlu0.b32.cont [7/16] (narrow) %v36_v14, 16  ;;  %v571_v47 = vld [vmem:[%s834_s1 + $0x10] sm:$0xff]   ;;  %v572_v48 = vld [vmem:[%s834_s1 + $0x18] sm:$0xff]   ;;  %v573_v49 = vld [vmem:[%s836_s3] sm:$0xff]  }
  0x1d   :  { %97 = vperm.xlu1 %567, %v87_v17   ;;  %v574_v50 = vld [vmem:[%s836_s3 + $0x10] sm:$0xff]   ;;  %v407_v51 = vld [vmem:[%s838_s5] sm:$0xff] }
  0x1e   :  { %553 = vmatprep.mubr.msk.bf16.mxu1 %vm321_vm1, %v574_v50 }
  0x20   :  { %53 = vxpose.xlu0.b32.cont [8/16] (narrow) %v37_v16, 16 }
  0x21   :  { %102 = vperm.xlu1 %567, %v88_v19  }
  0x24   :  { %54 = vxpose.xlu0.b32.cont [9/16] (narrow) %v38_v18, 16 }
  0x25   :  { %263 = vperm.xlu1 %567, %v253_v21  }
  0x28   :  { %55 = vxpose.xlu0.b32.cont [10/16] (narrow) %v39_v20, 16 }
  0x29   :  { %268 = vperm.xlu1 %567, %v254_v23  }
  0x2c   :  { %56 = vxpose.xlu0.b32.cont [11/16] (narrow) %v40_v22, 16 }
  0x2d   :  { %273 = vperm.xlu1 %567, %v255_v25   ;;  %v576_v25 = vld [vmem:[%s836_s3 + $0x18] sm:$0xff]  }
  0x30   :  { %57 = vxpose.xlu0.b32.cont [12/16] (narrow) %v41_v24, 16  ;;  %v575_v24 = vld [vmem:[%s836_s3 + $0x8] sm:$0xff]   ;;  %s632_s3 = smov [#allocation3]  }
  0x31   :  { %278 = vperm.xlu1 %567, %v256_v27   ;;  %s494_s20 = sshll.u32 %s632_s3, 4  ;;  %s495_s20 = int_to_ptr.vmem [resolvable:$true] %s494_s20 }
  0x32   :  { %s609_s21 = scalar_lea.vmem %s495_s20, 16  ;;  %s613_s2 = scalar_lea.vmem %s495_s20, 32 }
  0x33   :  { %p610_p0 = scmp.ne.s32.totalorder %s495_s20, %s609_s21  ;;  %p614_p1 = scmp.lt.s32.totalorder %s495_s20, %s495_s20 }
  0x34   :  { %58 = vxpose.xlu0.b32.cont [13/16] (narrow) %v42_v26, 16  ;;  %p615_p2 = scmp.lt.s32.totalorder %s613_s2, %s609_s21 }
  0x35   :  { %283 = vperm.xlu1 %567, %v257_v29  }
  0x36   :  { %p616_p3 = por %p615_p2, %p614_p1 }
  0x38   :  { %59 = vxpose.xlu0.b32.cont [14/16] (narrow) %v43_v28, 16  ;;  %p617_p4 = pnand %p616_p3, %p610_p0 }
  0x39   :  { %288 = vperm.xlu1 %567, %v258_v31  }
  0x3c   :  { %60 = vxpose.xlu0.b32.cont [15/16] (narrow) %v44_v30, 16 }
  0x3d   :  { %293 = vperm.xlu1 %567, %v259_v33  }
  0x40   :  { %61 = vxpose.xlu0.b32.end [16/16] (narrow) %v45_v32, 16 }
  0x41   :  { %298 = vperm.xlu1 %567, %v260_v34  }
  0x45   :  { %422 = vperm.xlu1 %567, %v408_v35  }
  0x49   :  { %427 = vperm.xlu1 %567, %v409_v36  }
  0x4d   :  { %432 = vperm.xlu1 %567, %v410_v37  }
  0x51   :  { %437 = vperm.xlu1 %567, %v411_v38  }
  0x55   :  { %442 = vperm.xlu1 %567, %v412_v39  }
  0x59   :  { %447 = vperm.xlu1 %567, %v413_v40  }
  0x5d   :  { %452 = vperm.xlu1 %567, %v414_v41  }
  0x61   :  { %479 = vperm.xlu1 %567, %v476_v42  }
  0x69   :  { %568 = vset.pattern.permute.xlu0 %v631_v2 }
  0x6a   :  { %417 = vperm.xlu0 %568, %v407_v51  }
  0x80   :  { %v62_v43 = vpop.trf.xlu0  ;;  %v128_v52 = vpop.permute.xlu1 %127 }
  0x84   :  { %v63_v44 = vpop.trf.xlu0  ;;  %v133_v53 = vpop.permute.xlu1 %132 }
  0x85   :  { %v78_v45 = vpack.c.bf16 %v63_v44, %v62_v43 }
  0x87   :  { %531 = vmatprep.subr.bf16.mxu0 %v78_v45 }
  0x88   :  { %532 = vmatpush3.bf16.msra.mxu0 %v78_v45  ;;  %v118_v54 = vpop.permute.xlu1 %117 }
  0x8b   :  { %534 = vmatmul.mubr.msk.bf16.vlgmr.msra.gmra.mxu0 %vm155_vm0, %v570_v46 }
  0x8c   :  { %537 = vmatprep.mubr.msk.bf16.mxu0 %vm155_vm0, %v571_v47  ;;  %v123_v55 = vpop.permute.xlu1 %122 }
  0x90   :  { %v108_v56 = vpop.permute.xlu1 %107 }
  0x93   :  { %538 = vmatmul.mubr.msk.bf16.gmra.mxu0 %vm155_vm0, %v572_v48 }
  0x94   :  { %549 = vmatprep.mubr.msk.bf16.mxu0 %vm321_vm1, %v573_v49  ;;  %v113_v60 = vpop.permute.xlu1 %112 }
  0x98   :  { %v98_v1 = vpop.permute.xlu1 %97 }
  0x9c   :  { %v103_v9 = vpop.permute.xlu1 %102 }
  0xa0   :  { %v264_v26 = vpop.permute.xlu1 %263 }
  0xa4   :  { %v269_v27 = vpop.permute.xlu1 %268 }
  0xa8   :  { %v274_v28 = vpop.permute.xlu1 %273 }
  0xac   :  { %v279_v29 = vpop.permute.xlu1 %278 }
  0xb0   :  { %v284_v30 = vpop.permute.xlu1 %283 }
  0xb4   :  { %v289_v31 = vpop.permute.xlu1 %288 }
  0xb8   :  { %v294_v32 = vpop.permute.xlu1 %293 }
  0xbc   :  { %v299_v33 = vpop.permute.xlu1 %298 }
  0xc0   :  { %v423_v34 = vpop.permute.xlu1 %422 }
  0xc4   :  { %v428_v39 = vpop.permute.xlu1 %427 }
  0xc8   :  { %v433_v49 = vpop.permute.xlu1 %432 }
 0x14b   :  { %v535_v57 = vpop.f32.mrf.mxu0 }
 0x14c   :  { %v211_v8 = vadd.f32 %v535_v57, %v108_v56 }
 0x14d   :  { %v202_v58 = vpop.f32.mrf.mxu0 }
 0x14e   :  { %v203_v11 = vadd.f32 %v202_v58, %v98_v1 }
 0x14f   :  { %v536_v59 = vpop.f32.mrf.mxu0 }
 0x150   :  { %v214_v6 = vadd.f32 %v536_v59, %v113_v60 }
 0x151   :  { %v205_v61 = vpop.f32.mrf.mxu0 }
 0x152   :  { %v206_v10 = vadd.f32 %v205_v61, %v103_v9 }
 0x153   :  { %v539_v62 = vpop.f32.mrf.mxu0 }
 0x154   :  { %v227_v63 = vadd.f32 %v539_v62, %v128_v52 }
 0x155   :  { %v218_v0 = vpop.f32.mrf.mxu0 }
 0x156   :  { %v219_v2 = vadd.f32 %v218_v0, %v118_v54  ;;  %577 = vtanh.f32 %v227_v63 }
 0x157   :  { %v540_v3 = vpop.f32.mrf.mxu0 }
 0x158   :  { %v230_v4 = vadd.f32 %v540_v3, %v133_v53  ;;  %v438_v53 = vpop.permute.xlu1 %437 }
 0x159   :  { %v221_v5 = vpop.f32.mrf.mxu0 }
 0x15a   :  { %579 = vtanh.f32 %v230_v4  ;;  %v222_v7 = vadd.f32 %v221_v5, %v123_v55  ;;  %v418_v55 = vpop.permute.xlu0 %417 }
 0x15b   :  { %581 = vtanh.f32 %v219_v2 }
 0x15c   :  { %583 = vtanh.f32 %v222_v7  ;;  %v443_v58 = vpop.permute.xlu1 %442 }
 0x15d   :  { %585 = vtanh.f32 %v214_v6 }
 0x15e   :  { %587 = vtanh.f32 %v211_v8 }
 0x15f   :  { %589 = vtanh.f32 %v206_v10 }
 0x160   :  { %591 = vtanh.f32 %v203_v11  ;;  %v448_v4 = vpop.permute.xlu1 %447 }
 0x163   :  { %v578_v12 = vpop.eup %577 }
 0x167   :  { %v580_v13 = vpop.eup %579 }
 0x168   :  { %v582_v14 = vpop.eup %581  ;;  %v252_v15 = vpack.c.bf16 %v580_v13, %v578_v12  ;;  %v453_v13 = vpop.permute.xlu1 %452 }
 0x169   :  { %v584_v16 = vpop.eup %583 }
 0x16a   :  { %541 = vmatprep.subr.bf16.mxu0 %v252_v15  ;;  %557 = vmatprep.subr.bf16.mxu1 %v252_v15  ;;  %v251_v17 = vpack.c.bf16 %v584_v16, %v582_v14  ;;  %v586_v18 = vpop.eup %585  ;;  %v482_v16 = vlaneseq }
 0x16b   :  { %542 = vmatpush3.bf16.msra.mxu0 %v252_v15  ;;  %561 = vmatpush3.bf16.msra.mxu1 %v252_v15  ;;  %v588_v19 = vpop.eup %587 }
 0x16c   :  { %543 = vmatprep.subr.bf16.mxu0 %v251_v17  ;;  %558 = vmatprep.subr.bf16.mxu1 %v251_v17  ;;  %v250_v20 = vpack.c.bf16 %v586_v18, %v588_v19  ;;  %v590_v21 = vpop.eup %589  ;;  %v483_v19 = vshrl.u32 %v482_v16, 7 }
 0x16d   :  { %v592_v22 = vpop.eup %591 }
 0x16e   :  { %v249_v23 = vpack.c.bf16 %v590_v21, %v592_v22  ;;  %v484_v22 = vsub.s32 0, %v483_v19 }
 0x16f   :  { %544 = vmatpush3.bf16.msra.mxu0 %v251_v17  ;;  %562 = vmatpush3.bf16.msra.mxu1 %v251_v17 }
 0x170   :  { %545 = vmatprep.subr.bf16.mxu0 %v250_v20  ;;  %559 = vmatprep.subr.bf16.mxu1 %v250_v20 }
 0x173   :  { %546 = vmatpush3.bf16.msra.mxu0 %v250_v20  ;;  %563 = vmatpush3.bf16.msra.mxu1 %v250_v20 }
 0x174   :  { %547 = vmatprep.subr.bf16.mxu0 %v249_v23  ;;  %560 = vmatprep.subr.bf16.mxu1 %v249_v23 }
 0x177   :  { %548 = vmatpush3.bf16.msra.mxu0 %v249_v23  ;;  %564 = vmatpush3.bf16.msra.mxu1 %v249_v23 }
 0x17a   :  { %550 = vmatmul.mubr.msk.bf16.vlgmr.msra.gmra.mxu0 %vm321_vm1, %v575_v24  ;;  %554 = vmatmul.mubr.msk.bf16.vlgmr.msra.gmra.mxu1 %vm321_vm1, %v576_v25  ;;  %v480_v24 = vpop.permute.xlu1 %479 }
 0x23a   :  { %v551_v35 = vpop.f32.mrf.mxu0  ;;  %v555_v36 = vpop.f32.mrf.mxu1 }
 0x23b   :  { %v377_v41 = vadd.f32 %v551_v35, %v274_v28  ;;  %v393_v51 = vadd.f32 %v555_v36, %v294_v32 }
 0x23c   :  { %v368_v37 = vpop.f32.mrf.mxu0  ;;  %v384_v38 = vpop.f32.mrf.mxu1 }
 0x23d   :  { %v369_v40 = vadd.f32 %v368_v37, %v264_v26  ;;  %v385_v48 = vadd.f32 %v384_v38, %v284_v30  ;;  %v485_v26 = vrot.slane %v480_v24, %v484_v22 }
 0x23e   :  { %v552_v42 = vpop.f32.mrf.mxu0  ;;  %v556_v43 = vpop.f32.mrf.mxu1 }
 0x23f   :  { %593 = vtanh.f32 %v369_v40  ;;  %v380_v45 = vadd.f32 %v552_v42, %v279_v29  ;;  %v396_v52 = vadd.f32 %v556_v43, %v299_v33 }
 0x240   :  { %v371_v44 = vpop.f32.mrf.mxu0  ;;  %595 = vtanh.f32 %v377_v41  ;;  %v387_v47 = vpop.f32.mrf.mxu1 }
 0x241   :  { %v372_v46 = vadd.f32 %v371_v44, %v269_v27  ;;  %v388_v50 = vadd.f32 %v387_v47, %v289_v31 }
 0x243   :  { %597 = vtanh.f32 %v372_v46 }
 0x244   :  { %599 = vtanh.f32 %v380_v45 }
 0x245   :  { %601 = vtanh.f32 %v385_v48 }
 0x246   :  { %603 = vtanh.f32 %v388_v50 }
 0x247   :  { %605 = vtanh.f32 %v393_v51 }
 0x248   :  { %607 = vtanh.f32 %v396_v52 }
 0x24c   :  { %v594_v54 = vpop.eup %593 }
 0x24d   :  { %v596_v56 = vpop.eup %595  ;;  %v455_v60 = vmul.f32 %v594_v54, %v418_v55 }
 0x24e   :  { %v457_v62 = vmul.f32 %v596_v56, %v428_v39 }
 0x250   :  { %v598_v57 = vpop.eup %597 }
 0x251   :  { %v456_v59 = vmul.f32 %v598_v57, %v423_v34  ;;  %v600_v61 = vpop.eup %599 }
 0x252   :  { %v602_v0 = vpop.eup %601  ;;  %v458_v1 = vmul.f32 %v600_v61, %v433_v49 }
 0x253   :  { %v463_v63 = vadd.f32 %v456_v59, %v455_v60  ;;  %v604_v3 = vpop.eup %603  ;;  %v459_v5 = vmul.f32 %v602_v0, %v438_v53 }
 0x254   :  { %v606_v7 = vpop.eup %605  ;;  %v460_v8 = vmul.f32 %v604_v3, %v443_v58 }
 0x255   :  { %v464_v2 = vadd.f32 %v463_v63, %v457_v62  ;;  %v608_v10 = vpop.eup %607  ;;  %v461_v12 = vmul.f32 %v606_v7, %v448_v4 }
 0x256   :  { %v462_v14 = vmul.f32 %v608_v10, %v453_v13 }
 0x257   :  { %v465_v6 = vadd.f32 %v464_v2, %v458_v1 }
 0x259   :  { %v466_v9 = vadd.f32 %v465_v6, %v459_v5 }
 0x25b   :  { %v467_v11 = vadd.f32 %v466_v9, %v460_v8 }
 0x25d   :  { %v468_v15 = vadd.f32 %v467_v11, %v461_v12 }
 0x25f   :  { %v469_v17 = vadd.f32 %v468_v15, %v462_v14 }
 0x261   :  { %v470_v18 = vrot.slane %v469_v17, 4 }
 0x263   :  { %v471_v20 = vadd.f32 %v470_v18, %v469_v17 }
 0x265   :  { %v472_v21 = vrot.slane %v471_v20, 2 }
 0x267   :  { %v473_v23 = vadd.f32 %v472_v21, %v471_v20 }
 0x269   :  { %v474_v25 = vrot.slane %v473_v23, 1 }
 0x26b   :  { %v475_v27 = vadd.f32 %v474_v25, %v473_v23 }
 0x26d   :  { %v486_v28 = vadd.f32 %v485_v26, %v475_v27 }
 0x26f   :  { %487 = vst [vmem:[#allocation3] sm:$0x1] %v486_v28 }
 0x270   :  { %620 = shalt.err (!%p617_p4)
}
 0x271   :  { %497 = dma.vmem_to_hbm [thread:$0]  %s495_s20, 16, %s840_s7, [#allocation4]  }
 0x272   :  { %629 = dma.done.wait [#allocation4], 16  }
 0x273   :  { %630 = vsyncadd [#allocation4], 4294967280 }
 0x274   :  { %501 = vsyncpa [#allocation4], 1 }

</bundles_post_ra>
